<compile_context>
chip_gen: v7x
topology: tpu7x:2x2x1
jax: 0.10.0
libtpu: 0.0.40
codegen_flags: <defaults>
</compile_context>

<pallas_src>
import jax
import jax.numpy as jnp
from jax.experimental import pallas as pl
from jax.experimental.pallas import tpu as pltpu


def build_grid(resolution):
    """JAX port of the PyTorch build_grid: returns [1, H, W, 4] float32."""
    ranges = [jnp.linspace(0.0, 1.0, num=res, dtype=jnp.float32) for res in resolution]
    mesh = jnp.meshgrid(*ranges, indexing="ij")          # torch.meshgrid default is 'ij'
    grid = jnp.stack(mesh, axis=-1)                      # [H, W, 2]
    grid = jnp.reshape(grid, (resolution[0], resolution[1], -1))
    grid = grid[None]                                    # [1, H, W, 2]
    return jnp.concatenate([grid, 1.0 - grid], axis=-1)  # [1, H, W, 4]


def _pos_embed_kernel(x_ref, grid_ref, w_ref, b_ref, o_ref):
    # x_ref   : (C, HW)  current batch element, NCHW-flattened (leading batch dim squeezed)
    # grid_ref: (4, HW)  position grid, lane-dense (resident across all grid steps)
    # w_ref   : (C, 4)   dense weight in original PyTorch [out, in] layout (resident)
    # b_ref   : (C, 1)   dense bias as a column (resident)
    # o_ref   : (C, HW)
    g = grid_ref[...].astype(jnp.float32)                # (4, HW)
    w = w_ref[...].astype(jnp.float32)                   # (C, 4)

    # K=4 contraction on the VPU, seeded with the bias column so the bias-add is free.
    # Each term is a (C,1) x (1,HW) broadcast multiply-add — 4 unrolled VPU ops total.
    emb = b_ref[...].astype(jnp.float32)                 # (C, 1) -> broadcasts over lanes
    emb = emb + w[:, 0:1] * g[0:1, :]
    emb = emb + w[:, 1:2] * g[1:2, :]
    emb = emb + w[:, 2:3] * g[2:3, :]
    emb = emb + w[:, 3:4] * g[3:4, :]                    # (C, HW)

    o_ref[...] = (x_ref[...].astype(jnp.float32) + emb).astype(o_ref.dtype)


def position_embed(inputs_nchw, grid_t, weight, bias_col):
    """inputs_nchw: [B, C, H, W]; grid_t: [4, H*W]; weight: [C, 4]; bias_col: [C, 1]."""
    B, C, H, W = inputs_nchw.shape
    HW = H * W
    x = inputs_nchw.reshape(B, C, HW)                    # free view, no data movement

    flops = 2 * B * C * HW * 4 + B * C * HW              # projection + residual add
    bytes_accessed = (x.size + x.size) * x.dtype.itemsize + (4 * HW + C * 4 + C) * 4

    out = pl.pallas_call(
        _pos_embed_kernel,
        out_shape=jax.ShapeDtypeStruct((B, C, HW), inputs_nchw.dtype),
        grid_spec=pltpu.PrefetchScalarGridSpec(
            num_scalar_prefetch=0,
            grid=(B,),
            in_specs=[
                pl.BlockSpec((None, C, HW), lambda b: (b, 0, 0)),  # x, batch dim squeezed
                pl.BlockSpec((4, HW), lambda b: (0, 0)),           # grid_t (resident)
                pl.BlockSpec((C, 4), lambda b: (0, 0)),            # weight (resident)
                pl.BlockSpec((C, 1), lambda b: (0, 0)),            # bias   (resident)
            ],
            out_specs=pl.BlockSpec((None, C, HW), lambda b: (b, 0, 0)),
        ),
        compiler_params=pltpu.CompilerParams(
            dimension_semantics=("parallel",),
        ),
        cost_estimate=pl.CostEstimate(
            flops=flops, transcendentals=0, bytes_accessed=bytes_accessed
        ),
    )(x, grid_t, weight, bias_col)

    return out.reshape(B, C, H, W)                       # free view back to NCHW


if __name__ == "__main__":
    # Small shapes consistent with the module: batch=2, hidden=32, spatial=16x16.
    B, hidden, H, W = 2, 32, 16, 16
    HW = H * W

    key = jax.random.PRNGKey(0)
    k_in, k_w, k_b = jax.random.split(key, 3)

    # Deterministic parameter init (PyTorch-like uniform(-1/sqrt(4), 1/sqrt(4))).
    bound = 1.0 / jnp.sqrt(4.0)
    weight = jax.random.uniform(k_w, (hidden, 4), jnp.float32, -bound, bound)  # [out, in]
    bias = jax.random.uniform(k_b, (hidden,), jnp.float32, -bound, bound)

    inputs = jax.random.normal(k_in, (B, hidden, H, W), jnp.float32)  # NCHW

    grid4 = build_grid((H, W))                    # [1, H, W, 4]
    grid_t = grid4.reshape(HW, 4).T               # [4, HW]  (lane-dense)
    bias_col = bias.reshape(hidden, 1)            # [C, 1]

    out = position_embed(inputs, grid_t, weight, bias_col)
    out = jax.block_until_ready(out)

    # Pure-JAX reference check of the hot path.
    emb_ref = grid4 @ weight.T + bias             # [1, H, W, hidden]
    ref = inputs + jnp.transpose(emb_ref, (0, 3, 1, 2))
    assert out.shape == (B, hidden, H, W)
    assert jnp.allclose(out, ref, atol=1e-5, rtol=1e-5)

    print("KERNEL_OK")
</pallas_src>

<mosaic_0001>
module attributes {stable_mosaic.version = 11 : i64} {
  func.func @_pos_embed_kernel(%arg0: i32, %arg1: memref<1x32x256xf32, #tpu.memory_space<vmem>>, %arg2: memref<4x256xf32, #tpu.memory_space<vmem>>, %arg3: memref<32x4xf32, #tpu.memory_space<vmem>>, %arg4: memref<32x1xf32, #tpu.memory_space<vmem>>, %arg5: memref<1x32x256xf32, #tpu.memory_space<vmem>>) attributes {dimension_semantics = [#tpu.dimension_semantics<parallel>], iteration_bounds = array<i64: 2>, scalar_prefetch = 0 : i64, scratch_operands = 0 : i64, tpu.core_type = #tpu.core_type<tc>, window_params = [{transform_indices = @transform_0, window_bounds = array<i64: 1, 32, 256>}, {pipeline_mode = #tpu.pipeline_mode<synchronous>, transform_indices = @transform_1, window_bounds = array<i64: 4, 256>}, {pipeline_mode = #tpu.pipeline_mode<synchronous>, transform_indices = @transform_2, window_bounds = array<i64: 32, 4>}, {pipeline_mode = #tpu.pipeline_mode<synchronous>, transform_indices = @transform_3, window_bounds = array<i64: 32, 1>}, {transform_indices = @transform_4, window_bounds = array<i64: 1, 32, 256>}]} {
    %c0 = arith.constant 0 : index
    %c0_0 = arith.constant 0 : index
    %0 = vector.load %arg2[%c0, %c0_0] : memref<4x256xf32, #tpu.memory_space<vmem>>, vector<4x256xf32>
    %c0_1 = arith.constant 0 : index
    %c0_2 = arith.constant 0 : index
    %1 = vector.load %arg3[%c0_1, %c0_2] : memref<32x4xf32, #tpu.memory_space<vmem>>, vector<32x4xf32>
    %c0_3 = arith.constant 0 : index
    %c0_4 = arith.constant 0 : index
    %2 = vector.load %arg4[%c0_3, %c0_4] : memref<32x1xf32, #tpu.memory_space<vmem>>, vector<32x1xf32>
    %3 = vector.extract_strided_slice %1 {offsets = [0, 0], sizes = [32, 1], strides = [1, 1]} : vector<32x4xf32> to vector<32x1xf32>
    %4 = vector.extract_strided_slice %0 {offsets = [0, 0], sizes = [1, 256], strides = [1, 1]} : vector<4x256xf32> to vector<1x256xf32>
    %5 = vector.broadcast %3 : vector<32x1xf32> to vector<32x256xf32>
    %6 = vector.broadcast %4 : vector<1x256xf32> to vector<32x256xf32>
    %7 = arith.mulf %5, %6 : vector<32x256xf32>
    %8 = vector.broadcast %2 : vector<32x1xf32> to vector<32x256xf32>
    %9 = arith.addf %8, %7 : vector<32x256xf32>
    %10 = vector.extract_strided_slice %1 {offsets = [0, 1], sizes = [32, 1], strides = [1, 1]} : vector<32x4xf32> to vector<32x1xf32>
    %11 = vector.extract_strided_slice %0 {offsets = [1, 0], sizes = [1, 256], strides = [1, 1]} : vector<4x256xf32> to vector<1x256xf32>
    %12 = vector.broadcast %10 : vector<32x1xf32> to vector<32x256xf32>
    %13 = vector.broadcast %11 : vector<1x256xf32> to vector<32x256xf32>
    %14 = arith.mulf %12, %13 : vector<32x256xf32>
    %15 = arith.addf %9, %14 : vector<32x256xf32>
    %16 = vector.extract_strided_slice %1 {offsets = [0, 2], sizes = [32, 1], strides = [1, 1]} : vector<32x4xf32> to vector<32x1xf32>
    %17 = vector.extract_strided_slice %0 {offsets = [2, 0], sizes = [1, 256], strides = [1, 1]} : vector<4x256xf32> to vector<1x256xf32>
    %18 = vector.broadcast %16 : vector<32x1xf32> to vector<32x256xf32>
    %19 = vector.broadcast %17 : vector<1x256xf32> to vector<32x256xf32>
    %20 = arith.mulf %18, %19 : vector<32x256xf32>
    %21 = arith.addf %15, %20 : vector<32x256xf32>
    %22 = vector.extract_strided_slice %1 {offsets = [0, 3], sizes = [32, 1], strides = [1, 1]} : vector<32x4xf32> to vector<32x1xf32>
    %23 = vector.extract_strided_slice %0 {offsets = [3, 0], sizes = [1, 256], strides = [1, 1]} : vector<4x256xf32> to vector<1x256xf32>
    %24 = vector.broadcast %22 : vector<32x1xf32> to vector<32x256xf32>
    %25 = vector.broadcast %23 : vector<1x256xf32> to vector<32x256xf32>
    %26 = arith.mulf %24, %25 : vector<32x256xf32>
    %27 = arith.addf %21, %26 : vector<32x256xf32>
    %c0_5 = arith.constant 0 : index
    %c0_6 = arith.constant 0 : index
    %c0_7 = arith.constant 0 : index
    %28 = vector.load %arg1[%c0_5, %c0_6, %c0_7] : memref<1x32x256xf32, #tpu.memory_space<vmem>>, vector<1x32x256xf32>
    %29 = vector.shape_cast %28 : vector<1x32x256xf32> to vector<32x256xf32>
    %30 = arith.addf %29, %27 : vector<32x256xf32>
    %c0_8 = arith.constant 0 : index
    %c0_9 = arith.constant 0 : index
    %c0_10 = arith.constant 0 : index
    %31 = vector.load %arg5[%c0_8, %c0_9, %c0_10] : memref<1x32x256xf32, #tpu.memory_space<vmem>>, vector<1x32x256xf32>
    %32 = vector.shape_cast %31 : vector<1x32x256xf32> to vector<32x256xf32>
    %33 = vector.shape_cast %30 : vector<32x256xf32> to vector<1x32x256xf32>
    tpu.vector_store %arg5[%c0_8, %c0_9, %c0_10], %33 {strides = array<i32>} : memref<1x32x256xf32, #tpu.memory_space<vmem>>, vector<1x32x256xf32>,
    return
  }
  func.func @transform_0(%arg0: i32) -> (i32, i32, i32) {
    %c0_i32 = arith.constant 0 : i32
    %c0_i32_0 = arith.constant 0 : i32
    %c0_i32_1 = arith.constant 0 : i32
    return %arg0, %c0_i32, %c0_i32_0 : i32, i32, i32
  }
  func.func @transform_1(%arg0: i32) -> (i32, i32) {
    %c0_i32 = arith.constant 0 : i32
    %c0_i32_0 = arith.constant 0 : i32
    %c0_i32_1 = arith.constant 0 : i32
    return %c0_i32, %c0_i32_0 : i32, i32
  }
  func.func @transform_2(%arg0: i32) -> (i32, i32) {
    %c0_i32 = arith.constant 0 : i32
    %c0_i32_0 = arith.constant 0 : i32
    %c0_i32_1 = arith.constant 0 : i32
    return %c0_i32, %c0_i32_0 : i32, i32
  }
  func.func @transform_3(%arg0: i32) -> (i32, i32) {
    %c0_i32 = arith.constant 0 : i32
    %c0_i32_0 = arith.constant 0 : i32
    %c0_i32_1 = arith.constant 0 : i32
    return %c0_i32, %c0_i32_0 : i32, i32
  }
  func.func @transform_4(%arg0: i32) -> (i32, i32, i32) {
    %c0_i32 = arith.constant 0 : i32
    %c0_i32_0 = arith.constant 0 : i32
    %c0_i32_1 = arith.constant 0 : i32
    return %arg0, %c0_i32, %c0_i32_0 : i32, i32, i32
  }
}

</mosaic_0001>

<bundles_post_ra>
// kernel: tpu_custom_call.1
= control target key start
LH: loop header
LB: loop body
LE: loop exit
PB: predicated region body
PF: predicated region fallthrough
CT: control target
= control target key end

     0   :  { %9 = vsyncpa [#allocation3], 0  ;;  %s1018_s0 = inlined_call_operand.hbm [shape: f32[2,32,256], index: 0, kind: input, shape index: {}]   ;;  %s1019_s1 = inlined_call_operand.vmem [shape: f32[4,256], index: 1, kind: input, shape index: {}]   ;;  %s1020_s2 = inlined_call_operand.vmem [shape: f32[32,4], index: 2, kind: input, shape index: {}]   ;;  %s1021_s3 = inlined_call_operand.vmem [shape: f32[32,1], index: 3, kind: input, shape index: {}]   ;;  %s1022_s4 = inlined_call_operand.hbm [shape: f32[2,32,256], index: 4, kind: output, shape index: {}]  }
   0x1   :  { %11 = vsyncpa [#allocation3 + $0x1], 0 }
   0x2   :  { %12 = vsyncpa [#allocation4], 0 }
   0x3   :  { %14 = vsyncpa [#allocation4 + $0x1], 0  ;;  %s772_s15 = smov 0   ;;  %s774_s16 = smov 0  }
   0x4   :  { %s776_s17 = smov 0   ;;  %s778_s18 = smov 0  }
   0x5 LB: > { %s793_s19 = sadd.s32 4294967295, %s735_s18   ;;  %s561_s20 = sadd.s32 4294967294, %s735_s18   ;;  %s735_s18 = sphi %s778_s18, %s1035_s18   ;;  %s731_s17 = sphi %s776_s17, %s1034_s17   ;;  %s727_s16 = sphi %s774_s16, %s1033_s16   ;;  %s723_s15 = sphi %s772_s15, %s1032_s15  }
   0x6   : > { %s797_s21 = sadd.s32 1, %s735_s18   ;;  %s27_s22 = sadd.s32 1, %s731_s17 }
   0x7   : > { %s24_s23 = ssub.s32 %s735_s18, %s797_s21  ;;  %p34_p0 = scmp.ne.s32.totalorder %s731_s17, %s727_s16 }
   0x8   : > { %p25_p1 = scmp.eq.s32.totalorder %s24_s23, 0  ;;  %p35_p2 = scmp.eq.s32.totalorder %s735_s18, 0 }
   0x9   : > { %p40_p3 = scmp.ne.s32.totalorder %s727_s16, %s723_s15  ;;  %p41_p4 = scmp.eq.s32.totalorder %s793_s19, 0 }
   0xa   : > { %s809_s24 = scalar_select %p25_p1, %s731_s17, %s27_s22  }
   0xb   : > { %p811_p5 = por %p35_p2, %p34_p0  ;;  %p815_p6 = por %p41_p4, %p40_p3 }
   0xc   : > { %p127_p7 = scmp.eq.s32.totalorder %s793_s19, 1  ;;  %p133_p8 = scmp.eq.s32.totalorder %s561_s20, 1 }
   0xd   : > { %p589_p10 = scmp.lt.s32.totalorder %s735_s18, 2  ;;  %s162_s29 = sand.u32 1, %s731_s17  }
   0xe   : > { %p822_p11 = por %p127_p7, %p34_p0  ;;  %p826_p12 = por %p133_p8, %p40_p3 }
   0xf   : > { %s575_s30 = sshll.u32 %s735_s18, 10  ;;  %s564_s5 = sshll.u32 %s162_s29, 6 }
  0x10   : > { %s1026_s27 = scalar_select %p822_p11, 1, 0 }
  0x11   : > { %s1027_s28 = scalar_select %p826_p12, 1, 0 }
  0x12   : > { %s835_s8 = scalar_lea.hbm %s1018_s0, %s575_s30  ;;  %s166_s9 = scalar_lea.vmem [#allocation2], %s564_s5 }
  0x13   : > { %s173_s10 = sshll.u32 %s166_s9, 4  ;;  %p839_p13 = pnand %p589_p10, %p811_p5  ;;  %s843_s10 = int_to_ptr.vmem [resolvable:$true] %s173_s10 }
  0x14   : > { %s845_s12 = scalar_lea.sflag [#allocation3], %s162_s29  ;;  %s639_s13 = scalar_lea.hbm %s835_s8, 1024 }
  0x15   : > { %p640_p0 = scmp.ne.s32.totalorder %s835_s8, %s639_s13  ;;  %p641_p1 = pneg %p839_p13 }
  0x16   : > { %s644_s22 = scalar_lea.hbm %s1018_s0, 2048  ;;  %p645_p4 = scmp.lt.u32.totalorder %s835_s8, %s1018_s0 }
  0x17   : > { %p642_p2 = pnand %p641_p1, %p640_p0  ;;  %p646_p5 = scmp.lt.u32.totalorder %s644_s22, %s639_s13 }
  0x18   : > { %p648_p8 = scmp.lt.u32.totalorder %s639_s13, %s835_s8 }
  0x19   : > { %p643_p3 = pneg %p642_p2  ;;  %p647_p7 = por %p646_p5, %p645_p4 }
  0x1b   : > { %p649_p10 = por %p648_p8, %p647_p7 }
  0x1d   : > { %p650_p9 = pnand %p649_p10, %p643_p3 }
  0x1f   : > { %653 = shalt.err (!%p650_p9)
}
  0x20   : > { %s654_s29 = scalar_lea.vmem %s843_s10, 1024  ;;  %s737_s30 = smov [#allocation2]  }
  0x21   : > { %p655_p0 = scmp.ne.s32.totalorder %s843_s10, %s654_s29  ;;  %s659_s5 = sshll.u32 %s737_s30, 4  ;;  %s660_s5 = int_to_ptr.vmem [resolvable:$false] %s659_s5 }
  0x22   : > { %s661_s6 = scalar_lea.vmem %s660_s5, 2048  ;;  %p662_p11 = scmp.lt.s32.totalorder %s843_s10, %s660_s5 }
  0x23   : > { %p657_p2 = pnand %p655_p0, %p641_p1  ;;  %p663_p4 = scmp.lt.s32.totalorder %s661_s6, %s654_s29 }
  0x25   : > { %p658_p12 = pneg %p657_p2  ;;  %p664_p5 = por %p663_p4, %p662_p11 }
  0x27   : > { %p665_p7 = pnand %p664_p5, %p658_p12 }
  0x29   : > { %668 = shalt.err (!%p665_p7)
}
  0x2a   : > { %s738_s7 = smov 256   ;;  %s739_s9 = smov 16  }
  0x2b   : > { %584 = dma.hbm_to_vmem [thread:$0]  (!%p839_p13), %s835_s8, 1024, %s843_s10, %s845_s12, %s738_s7, %s738_s7, %s739_s9  }
  0x2c   : > { %p567_p9 = scmp.ge.s32.totalorder %s735_s18, 1  ;;  %p181_p1 = scmp.lt.s32.totalorder %s735_s18, 3 }
  0x2e   : > { %p182_p3 = pnand %p567_p9, %p181_p1 }
  0x2f   : > { %s876_s13 = sand.u32 (!%p182_p3), 1, %s727_s16  }
  0x30   : > { %185 = sbr.rel (%p182_p3) target bundleno = 250 (0xfa), region = 36  ;;  %s568_s14 = sshll.u32 (!%p182_p3), %s876_s13, 6 }
  0x31   : > { %s188_s20 = scalar_lea.sflag (!%p182_p3), [#allocation3], %s876_s13  ;;  %s882_s22 = scalar_lea.vmem (!%p182_p3), [#allocation2], %s568_s14 }
  0x37   : > { %714 = dma.done.wait (%p815_p6), %s188_s20, 1024  }
  0x38   : > { %716 = vsyncadd (%p815_p6), %s188_s20, 4294966272  ;;  %v740_v0 = vmov 0   ;;  %v219_v1 = vld [vmem:[%s1020_s2 + $0x10] sm:$0xff]  ;;  %v217_v2 = vld [vmem:[%s1020_s2] sm:$0xff]  ;;  %v741_v9 = vmov 1   ;;  %v742_v10 = vmov 2   ;;  %v246_v16 = vlaneseq }
  0x39   : > { %632 = vset.pattern.permute.xlu1 %v740_v0  ;;  %631 = vset.pattern.permute.xlu0 %v740_v0  ;;  %v220_v3 = vld [vmem:[%s1020_s2 + $0x18] sm:$0xff]  ;;  %v218_v4 = vld [vmem:[%s1020_s2 + $0x8] sm:$0xff]  ;;  %v221_v6 = vld [vmem:[%s1021_s3] sm:$0xff]  ;;  %v743_v11 = vmov 3   ;;  %s945_s23 = scalar_lea.vmem [#allocation5], %s568_s14  ;;  %s576_s14 = sshll.u32 %s793_s19, 10 }
  0x3a   : > { %237 = vperm.xlu1 %632, %v219_v1   ;;  %227 = vperm.xlu0 %631, %v217_v2   ;;  %v222_v5 = vld [vmem:[%s1021_s3 + $0x8] sm:$0xff]  ;;  %v224_v7 = vld [vmem:[%s1021_s3 + $0x18] sm:$0xff]  ;;  %v223_v8 = vld [vmem:[%s1021_s3 + $0x10] sm:$0xff]  ;;  %v247_v19 = vshrl.u32 %v246_v16, 7  ;;  %s488_s25 = sshll.u32 %s945_s23, 4  ;;  %s970_s30 = scalar_lea.hbm %s1022_s4, %s576_s14  ;;  %s972_s25 = int_to_ptr.vmem [resolvable:$true] %s488_s25 }
  0x3b   : > { %v216_v26 = vld [vmem:[%s1019_s1] sm:$0xff]  ;;  %s475_s19 = scalar_lea.sflag [#allocation4], %s876_s13  ;;  %p1029_p11 = scmp.ne.s32.totalorder %s1026_s27, 0 }
  0x3c   : > { %v248_v22 = vsub.s32 0, %v247_v19  ;;  %v252_v23 = vsub.s32 4, %v247_v19  ;;  %v318_v24 = vsub.s32 1, %v247_v19  ;;  %v322_v25 = vsub.s32 5, %v247_v19  ;;  %s744_s5 = smov [#allocation5]  }
  0x3d   : > { %v368_v27 = vsub.s32 2, %v247_v19  ;;  %v372_v28 = vsub.s32 6, %v247_v19  ;;  %v418_v35 = vsub.s32 3, %v247_v19  ;;  %v422_v36 = vsub.s32 7, %v247_v19  ;;  %s673_s6 = sshll.u32 %s744_s5, 4  ;;  %s674_s6 = int_to_ptr.vmem [resolvable:$false] %s673_s6 }
  0x3e   : > { %242 = vperm.xlu1 %632, %v220_v3   ;;  %232 = vperm.xlu0 %631, %v218_v4   ;;  %v249_v31 = vrot.slane %v216_v26, %v248_v22  ;;  %v253_v32 = vrot.slane %v216_v26, %v252_v23  ;;  %v319_v33 = vrot.slane %v216_v26, %v318_v24  ;;  %v450_v23 = vld [vmem:[%s882_s22] sm:$0xff]  ;;  %s675_s7 = scalar_lea.vmem %s674_s6, 2048  ;;  %p676_p8 = scmp.lt.s32.totalorder %s972_s25, %s674_s6 }
  0x3f   : > { %v323_v34 = vrot.slane %v216_v26, %v322_v25  ;;  %v369_v37 = vrot.slane %v216_v26, %v368_v27  ;;  %v373_v38 = vrot.slane %v216_v26, %v372_v28  ;;  %v419_v45 = vrot.slane %v216_v26, %v418_v35 }
  0x40   : > { %v259_v41 = vrot.slane %v249_v31, %v248_v22  ;;  %v263_v42 = vrot.slane %v253_v32, %v248_v22  ;;  %v329_v43 = vrot.slane %v319_v33, %v318_v24  ;;  %v423_v46 = vrot.slane %v216_v26, %v422_v36 }
  0x41   : > { %v333_v44 = vrot.slane %v323_v34, %v318_v24  ;;  %v919_v49 = vrot.slane %v369_v37, %v368_v27  ;;  %v921_v50 = vrot.slane %v373_v38, %v368_v27  ;;  %v923_v55 = vrot.slane %v419_v45, %v418_v35  ;;  %v451_v24 = vld [vmem:[%s882_s22 + $0x8] sm:$0xff] }
  0x42   : > { %279 = vperm.xlu1 %632, %v222_v5   ;;  %274 = vperm.xlu0 %631, %v221_v6   ;;  %v925_v56 = vrot.slane %v423_v46, %v418_v35 }
  0x46   : > { %289 = vperm.xlu1 %632, %v224_v7   ;;  %284 = vperm.xlu0 %631, %v223_v8  }
  0x4a   : > { %634 = vset.pattern.permute.xlu1 %v741_v9  ;;  %633 = vset.pattern.permute.xlu0 %v741_v9 }
  0x4b   : > { %305 = vperm.xlu1 %634, %v218_v4   ;;  %301 = vperm.xlu0 %633, %v217_v2  }
  0x4f   : > { %309 = vperm.xlu1 %634, %v219_v1   ;;  %313 = vperm.xlu0 %633, %v220_v3  }
  0x53   : > { %635 = vset.pattern.permute.xlu1 %v742_v10  ;;  %636 = vset.pattern.permute.xlu0 %v742_v10 }
  0x54   : > { %351 = vperm.xlu1 %635, %v217_v2   ;;  %355 = vperm.xlu0 %636, %v218_v4  }
  0x58   : > { %359 = vperm.xlu1 %635, %v219_v1   ;;  %637 = vset.pattern.permute.xlu0 %v743_v11 }
  0x59   : > { %401 = vperm.xlu0 %637, %v217_v2  }
  0x5c   : > { %363 = vperm.xlu1 %635, %v220_v3  }
  0x5d   : > { %413 = vperm.xlu0 %637, %v220_v3  }
  0x60   : > { %638 = vset.pattern.permute.xlu1 %v743_v11 }
  0x61   : > { %405 = vperm.xlu1 %638, %v218_v4  }
  0x65   : > { %409 = vperm.xlu1 %638, %v219_v1  }
  0xb9   : > { %v238_v12 = vpop.permute.xlu1 %237  ;;  %v228_v13 = vpop.permute.xlu0 %227 }
  0xba   : > { %v264_v47 = vmul.f32 %v259_v41, %v228_v13  ;;  %v265_v48 = vmul.f32 %v263_v42, %v228_v13  ;;  %v268_v6 = vmul.f32 %v259_v41, %v238_v12  ;;  %v269_v7 = vmul.f32 %v263_v42, %v238_v12 }
  0xbd   : > { %v243_v14 = vpop.permute.xlu1 %242  ;;  %v233_v15 = vpop.permute.xlu0 %232 }
  0xbe   : > { %v270_v61 = vmul.f32 %v259_v41, %v243_v14  ;;  %v271_v62 = vmul.f32 %v263_v42, %v243_v14  ;;  %v266_v63 = vmul.f32 %v259_v41, %v233_v15  ;;  %v267_v0 = vmul.f32 %v263_v42, %v233_v15 }
  0xc1   : > { %v912_v17 = vpop.permute.xlu1 %279  ;;  %v275_v18 = vpop.permute.xlu0 %274 }
  0xc2   : > { %v292_v57 = vadd.f32 %v275_v18, %v264_v47  ;;  %v293_v58 = vadd.f32 %v275_v18, %v265_v48  ;;  %v294_v15 = vadd.f32 %v912_v17, %v266_v63  ;;  %v295_v18 = vadd.f32 %v912_v17, %v267_v0  ;;  %v456_v47 = vld [vmem:[%s882_s22 + $0x30] sm:$0xff] }
  0xc5   : > { %v290_v20 = vpop.permute.xlu1 %289  ;;  %v914_v21 = vpop.permute.xlu0 %284 }
  0xc6   : > { %v298_v8 = vadd.f32 %v290_v20, %v270_v61  ;;  %v299_v9 = vadd.f32 %v290_v20, %v271_v62  ;;  %v296_v41 = vadd.f32 %v914_v21, %v268_v6  ;;  %v297_v42 = vadd.f32 %v914_v21, %v269_v7  ;;  %v454_v7 = vld [vmem:[%s882_s22 + $0x20] sm:$0xff] }
  0xca   : > { %v306_v29 = vpop.permute.xlu1 %305  ;;  %v302_v30 = vpop.permute.xlu0 %301 }
  0xcb   : > { %v334_v51 = vmul.f32 %v329_v43, %v302_v30  ;;  %v335_v52 = vmul.f32 %v333_v44, %v302_v30  ;;  %v336_v19 = vmul.f32 %v329_v43, %v306_v29  ;;  %v337_v22 = vmul.f32 %v333_v44, %v306_v29 }
  0xcd   : > { %v342_v1 = vadd.f32 %v334_v51, %v292_v57  ;;  %v343_v2 = vadd.f32 %v335_v52, %v293_v58  ;;  %v344_v45 = vadd.f32 %v336_v19, %v294_v15  ;;  %v345_v46 = vadd.f32 %v337_v22, %v295_v18 }
  0xce   : > { %v310_v39 = vpop.permute.xlu1 %309  ;;  %v314_v40 = vpop.permute.xlu0 %313 }
  0xcf   : > { %v340_v3 = vmul.f32 %v329_v43, %v314_v40  ;;  %v341_v4 = vmul.f32 %v333_v44, %v314_v40  ;;  %v338_v36 = vmul.f32 %v329_v43, %v310_v39  ;;  %v339_v37 = vmul.f32 %v333_v44, %v310_v39  ;;  %v457_v43 = vld [vmem:[%s882_s22 + $0x38] sm:$0xff] }
  0xd1   : > { %v348_v25 = vadd.f32 %v340_v3, %v298_v8  ;;  %v349_v26 = vadd.f32 %v341_v4, %v299_v9  ;;  %v346_v58 = vadd.f32 %v338_v36, %v296_v41  ;;  %v455_v8 = vld [vmem:[%s882_s22 + $0x28] sm:$0xff] }
  0xd3   : > { %v352_v53 = vpop.permute.xlu1 %351  ;;  %v356_v54 = vpop.permute.xlu0 %355 }
  0xd4   : > { %v384_v59 = vmul.f32 %v919_v49, %v352_v53  ;;  %v385_v60 = vmul.f32 %v921_v50, %v352_v53  ;;  %v386_v28 = vmul.f32 %v919_v49, %v356_v54  ;;  %v387_v30 = vmul.f32 %v921_v50, %v356_v54 }
  0xd6   : > { %v392_v11 = vadd.f32 %v384_v59, %v342_v1  ;;  %v393_v13 = vadd.f32 %v385_v60, %v343_v2  ;;  %v394_v52 = vadd.f32 %v386_v28, %v344_v45  ;;  %v395_v53 = vadd.f32 %v387_v30, %v345_v46 }
  0xd7   : > { %v360_v5 = vpop.permute.xlu1 %359  ;;  %v347_v59 = vadd.f32 %v339_v37, %v297_v42 }
  0xd8   : > { %v402_v10 = vpop.permute.xlu0 %401  ;;  %v388_v39 = vmul.f32 %v919_v49, %v360_v5  ;;  %v389_v44 = vmul.f32 %v921_v50, %v360_v5 }
  0xd9   : > { %v434_v16 = vmul.f32 %v923_v55, %v402_v10  ;;  %v435_v14 = vmul.f32 %v925_v56, %v402_v10 }
  0xda   : > { %v396_v0 = vadd.f32 %v388_v39, %v346_v58  ;;  %v397_v1 = vadd.f32 %v389_v44, %v347_v59 }
  0xdb   : > { %v442_v12 = vadd.f32 %v434_v16, %v392_v11  ;;  %v443_v27 = vadd.f32 %v435_v14, %v393_v13  ;;  %v364_v20 = vpop.permute.xlu1 %363 }
  0xdc   : > { %v390_v31 = vmul.f32 %v919_v49, %v364_v20  ;;  %v391_v32 = vmul.f32 %v921_v50, %v364_v20  ;;  %v414_v33 = vpop.permute.xlu0 %413  ;;  %v452_v49 = vld [vmem:[%s882_s22 + $0x10] sm:$0xff]  ;;  %v453_v50 = vld [vmem:[%s882_s22 + $0x18] sm:$0xff]  ;;  %s669_s22 = scalar_lea.vmem %s972_s25, 1024 }
  0xdd   : > { %v458_v17 = vadd.f32 %v450_v23, %v442_v12  ;;  %v459_v29 = vadd.f32 %v451_v24, %v443_v27  ;;  %v440_v34 = vmul.f32 %v923_v55, %v414_v33  ;;  %v441_v35 = vmul.f32 %v925_v56, %v414_v33  ;;  %p670_p6 = scmp.ne.s32.totalorder %s972_s25, %s669_s22  ;;  %p677_p10 = scmp.lt.s32.totalorder %s675_s7, %s669_s22 }
  0xde   : > { %v398_v38 = vadd.f32 %v390_v31, %v348_v25  ;;  %v399_v40 = vadd.f32 %v391_v32, %v349_v26 }
  0xdf   : > { %466 = vst [vmem:[%s945_s23] sm:$0xff] %v458_v17  ;;  %467 = vst [vmem:[%s945_s23 + $0x8] sm:$0xff] %v459_v29  ;;  %p671_p12 = pnand %p670_p6, %p1029_p11  ;;  %p678_p0 = por %p677_p10, %p676_p8 }
  0xe0   : > { %v448_v48 = vadd.f32 %v440_v34, %v398_v38  ;;  %v449_v51 = vadd.f32 %v441_v35, %v399_v40  ;;  %v406_v21 = vpop.permute.xlu1 %405 }
  0xe1   : > { %v436_v54 = vmul.f32 %v923_v55, %v406_v21  ;;  %v437_v57 = vmul.f32 %v925_v56, %v406_v21  ;;  %p672_p13 = pneg %p671_p12 }
  0xe2   : > { %v464_v60 = vadd.f32 %v456_v47, %v448_v48  ;;  %v465_v61 = vadd.f32 %v457_v43, %v449_v51 }
  0xe3   : > { %v444_v62 = vadd.f32 %v436_v54, %v394_v52  ;;  %v445_v63 = vadd.f32 %v437_v57, %v395_v53  ;;  %p679_p2 = pnand %p678_p0, %p672_p13 }
  0xe4   : > { %472 = vst [vmem:[%s945_s23 + $0x30] sm:$0xff] %v464_v60  ;;  %473 = vst [vmem:[%s945_s23 + $0x38] sm:$0xff] %v465_v61  ;;  %v410_v2 = vpop.permute.xlu1 %409 }
  0xe5   : > { %v460_v3 = vadd.f32 %v452_v49, %v444_v62  ;;  %v461_v4 = vadd.f32 %v453_v50, %v445_v63  ;;  %v438_v5 = vmul.f32 %v923_v55, %v410_v2  ;;  %v439_v6 = vmul.f32 %v925_v56, %v410_v2 }
  0xe7   : > { %468 = vst [vmem:[%s945_s23 + $0x10] sm:$0xff] %v460_v3  ;;  %469 = vst [vmem:[%s945_s23 + $0x18] sm:$0xff] %v461_v4  ;;  %v446_v9 = vadd.f32 %v438_v5, %v396_v0  ;;  %v447_v10 = vadd.f32 %v439_v6, %v397_v1 }
  0xe9   : > { %v462_v55 = vadd.f32 %v454_v7, %v446_v9  ;;  %v463_v56 = vadd.f32 %v455_v8, %v447_v10 }
  0xeb   : > { %470 = vst [vmem:[%s945_s23 + $0x20] sm:$0xff] %v462_v55  ;;  %471 = vst [vmem:[%s945_s23 + $0x28] sm:$0xff] %v463_v56 }
  0xec   : > { %682 = shalt.err (!%p679_p2)
}
  0xed   : > { %s683_s9 = scalar_lea.hbm %s970_s30, 1024  ;;  %s687_s10 = scalar_lea.hbm %s1022_s4, 2048 }
  0xee   : > { %p684_p4 = scmp.ne.s32.totalorder %s970_s30, %s683_s9  ;;  %p688_p9 = scmp.lt.u32.totalorder %s970_s30, %s1022_s4 }
  0xef   : > { %p689_p1 = scmp.lt.u32.totalorder %s687_s10, %s683_s9  ;;  %p691_p6 = scmp.lt.u32.totalorder %s683_s9, %s970_s30 }
  0xf0   : > { %p685_p5 = pnand %p684_p4, %p1029_p11 }
  0xf1   : > { %p690_p3 = por %p689_p1, %p688_p9 }
  0xf2   : > { %p686_p7 = pneg %p685_p5 }
  0xf3   : > { %p692_p12 = por %p691_p6, %p690_p3 }
  0xf5   : > { %p693_p13 = pnand %p692_p12, %p686_p7 }
  0xf7   : > { %696 = shalt.err (!%p693_p13)
}
  0xf8   : > { %s745_s23 = smov 256   ;;  %s746_s14 = smov 16  }
  0xf9   : > { %579 = dma.vmem_to_hbm [thread:$0]  (%p1029_p11), %s972_s25, 1024, %s970_s30, %s475_s19, %s745_s23, %s745_s23, %s746_s14  }
  0xfa PF: > { %s503_s29 = sand.u32 1, %s723_s15   ;;  %p1030_p8 = scmp.ne.s32.totalorder %s1027_s28, 0 }
  0xfb   : > { %p1031_p10 = scmp.ge.s32.totalorder %s735_s18, 2  ;;  %s504_s26 = scalar_lea.sflag [#allocation4], %s503_s29 }
  0xfd   : > { %p586_p0 = pnand %p1031_p10, %p1030_p8 }
  0xff   : > { %718 = dma.done.wait (!%p586_p0), %s504_s26, 1024  }
 0x100   : > { %720 = vsyncadd (!%p586_p0), %s504_s26, 4294966272  ;;  %p17_p2 = scmp.ge.s32.totalorder %s797_s21, 4   ;;  %s1032_s15 = smov %s727_s16 }
 0x101   : > { %s1033_s16 = smov %s731_s17  ;;  %s1034_s17 = smov %s809_s24 }
 0x102   : > { %s1035_s18 = smov %s797_s21  ;;  %19 = sbr.rel (!%p17_p2) target bundleno = 5 (0x5), region = 81 }
 0x109   :  { %509 = vsyncpa [#allocation3], 1 }
 0x10a   :  { %511 = vsyncpa [#allocation3 + $0x1], 1 }
 0x10b   :  { %512 = vsyncpa [#allocation4], 1 }
 0x10c   :  { %514 = vsyncpa [#allocation4 + $0x1], 1 }

</bundles_post_ra>
